<compile_context>
chip_gen: v5e
topology: v5e:2x2
jax: 0.10.0
libtpu: 0.0.40
codegen_flags: <defaults>
</compile_context>

<pallas_src>
import jax
import jax.numpy as jnp
from jax import lax
from jax.experimental import pallas as pl
from jax.experimental.pallas import tpu as pltpu


# --------------------------------------------------------------------------- #
# VMEM-aware chunk sizing
# --------------------------------------------------------------------------- #
def _vmem_capacity_bytes():
    """Per-core VMEM capacity; conservative 64 MiB (v7x) if the query fails."""
    try:
        info = pltpu.get_tpu_info()
        cap = getattr(info, "vmem_capacity_bytes", None)
        if cap:
            return int(cap)
    except Exception:
        pass
    return 64 * 1024 * 1024


def _chunk_vmem_bytes(tc, batch, hidden, vpad, fc_bytes):
    """Approximate VMEM footprint of one grid step (blocks double-buffered)."""
    gin = tc * batch * 4 * hidden * 4            # gates_in block (f32)
    logits = batch * tc * vpad * 4               # logits block (f32)
    hs = tc * batch * hidden * 4                 # staging scratch (single copy)
    weights = (hidden * 4 * hidden * 4           # w_hh (f32)
               + hidden * vpad * fc_bytes        # w_fc (bf16/f32)
               + vpad * 4)                       # b_fc
    state = 4 * batch * hidden * 4               # h0, c0, h_n, c_n
    return 2 * (gin + logits + weights + state) + hs


def _pick_time_chunk(T, bytes_for_chunk, budget, max_chunk=256):
    """Largest sublane-friendly chunk dividing T whose blocks fit the budget."""
    cands = [tc for tc in range(8, min(T, max_chunk) + 1, 8) if T % tc == 0]
    if T <= max_chunk:
        cands.append(T)                          # block == full dim: always legal
    fitting = [tc for tc in cands if bytes_for_chunk(tc) <= budget]
    if fitting:
        return max(fitting)
    if cands:
        return min(cands)
    # TODO(synk): add a masked/ragged-chunk path for long T with no
    # multiple-of-8 divisor; falling back to a single whole-T chunk here.
    return T


# --------------------------------------------------------------------------- #
# Kernel
# --------------------------------------------------------------------------- #
def _lstm_chunk_kernel(gin_ref, h0_ref, c0_ref, whh_ref, wfc_ref, bfc_ref,
                       logits_ref, hn_ref, cn_ref, hs_sc):
    """One grid step == one chunk of Tc LSTM time steps.

    gin_ref   : (Tc, B, 4H) f32  precomputed x@W_ih + b, gate order [i, f, g, o]
    whh_ref   : (H, 4H)     f32  fused recurrent weights
    wfc_ref   : (H, Vp)          FC weights (bf16 operands, f32 accumulate)
    bfc_ref   : (1, Vp)     f32
    logits_ref: (B, Tc, Vp) f32  chunk of the (B, T, Vp) output
    hn_ref/cn_ref : (B, H)  f32  VMEM-resident carry + final state output
    hs_sc     : (Tc, B, H)  f32  per-chunk hidden-state staging scratch
    """
    chunk, batch, gdim = gin_ref.shape           # gdim == 4*H
    hidden = gdim // 4
    chunk_idx = pl.program_id(0)

    # Load the initial state into the resident output blocks, which double as
    # the cross-chunk carry (valid because the time axis is "arbitrary").
    @pl.when(chunk_idx == 0)
    def _():
        hn_ref[...] = h0_ref[...]
        cn_ref[...] = c0_ref[...]

    whh = whh_ref[...]                           # (H, 4H) — single fused dot RHS

    # Lane mask selecting the tanh gate ("g", lanes [2H, 3H)) out of the fused
    # (B, 4H) activations. Hoisted out of the loop (no per-iter broadcasts).
    lane = lax.broadcasted_iota(jnp.int32, (batch, gdim), 1)
    tanh_lane = (lane >= 2 * hidden) & (lane < 3 * hidden)

    def step(i, carry):
        h, c = carry
        # Single fused recurrent MXU push per step.
        pre = gin_ref[i] + jnp.dot(h, whh, preferred_element_type=jnp.float32)
        # One full-width sigmoid + one full-width tanh, lane-selected.
        act = jnp.where(tanh_lane, jnp.tanh(pre), jax.nn.sigmoid(pre))
        gi = act[:, 0 * hidden:1 * hidden]
        gf = act[:, 1 * hidden:2 * hidden]
        gg = act[:, 2 * hidden:3 * hidden]
        go = act[:, 3 * hidden:4 * hidden]
        c_new = gf * c + gi * gg
        h_new = go * jnp.tanh(c_new)
        hs_sc[i] = h_new                         # stage h_t for the batched FC
        return (h_new, c_new)

    h_fin, c_fin = lax.fori_loop(
        0, chunk, step, (hn_ref[...], cn_ref[...]),
        unroll=True if chunk <= 32 else 8)
    hn_ref[...] = h_fin
    cn_ref[...] = c_fin

    # Batched output projection for the whole chunk. Transpose the SMALL
    # (H-wide) hidden slab once so the matmul result lands directly in
    # (B, Tc, Vp) layout and is written with one lane-dense full-block store.
    hs_bt = jnp.transpose(hs_sc[...], (1, 0, 2))             # (B, Tc, H)
    wfc = wfc_ref[...]                                        # (H, Vp)
    flat = hs_bt.reshape(batch * chunk, hidden).astype(wfc.dtype)
    logits = (jnp.dot(flat, wfc, preferred_element_type=jnp.float32)
              + bfc_ref[...])                                 # (B*Tc, Vp) f32
    logits_ref[...] = logits.reshape(batch, chunk, -1).astype(logits_ref.dtype)


# --------------------------------------------------------------------------- #
# Wrapper
# --------------------------------------------------------------------------- #
def generator_forward(tokens, hidden, params, *, fc_matmul_dtype=jnp.bfloat16):
    """Pallas equivalent of Generator.forward(x, hidden).

    tokens : int32 (B, T)
    hidden : (h0, c0) each (1, B, H)   (PyTorch nn.LSTM convention)
    returns (logits (B, T, V) float32, (h_n, c_n) each (1, B, H))
    """
    emb_table = params["embedding"]        # (V, E)
    w_ih = params["w_ih"]                  # (E, 4H), gate order [i, f, g, o]
    w_hh = params["w_hh"]                  # (H, 4H)
    b = params["b"]                        # (1, 4H)  == bias_ih + bias_hh
    w_fc = params["w_fc"]                  # (H, V)
    b_fc = params["b_fc"]                  # (1, V)

    B, T = tokens.shape
    V, E = emb_table.shape
    H = w_hh.shape[0]

    h0 = hidden[0][0]                      # (B, H)
    c0 = hidden[1][0]                      # (B, H)

    # ---- Glue (plain JAX): embedding gather, directly in time-major layout.
    x_tbe = jnp.take(emb_table, tokens.T, axis=0)                 # (T, B, E)

    # ---- Hoist the input projection out of the recurrence: one (T*B,E)@(E,4H)
    # matmul, stored (T, B, 4H) so the kernel loads a lane-dense slab per step.
    gates_in = (x_tbe.reshape(T * B, E) @ w_ih + b).astype(jnp.float32)
    gates_in = gates_in.reshape(T, B, 4 * H)

    # Pad vocab to a multiple of 128 for a lane-dense logits block store.
    Vp = ((V + 127) // 128) * 128
    w_fc_p = jnp.pad(w_fc, ((0, 0), (0, Vp - V))) if Vp != V else w_fc
    b_fc_p = jnp.pad(b_fc, ((0, 0), (0, Vp - V))) if Vp != V else b_fc
    w_fc_p = w_fc_p.astype(fc_matmul_dtype)      # bf16 MXU operands
    b_fc_p = b_fc_p.astype(jnp.float32)
    fc_bytes = jnp.dtype(fc_matmul_dtype).itemsize

    # ---- VMEM-aware chunking (v7x 64 MiB vs v5e/v6e 128 MiB handled here).
    cap = _vmem_capacity_bytes()
    budget = int(0.70 * cap)
    block_bytes = lambda tc: _chunk_vmem_bytes(tc, B, H, Vp, fc_bytes)
    Tc = _pick_time_chunk(T, block_bytes, budget)
    num_chunks = T // Tc
    need = block_bytes(Tc)
    vmem_limit = int(max(need,
                         min(int(need * 1.3), int(0.95 * cap)),
                         32 * 1024 * 1024))

    const2 = lambda t: (0, 0)

    # TODO(synk): on v7x, split the batch across the 2 TensorCores with a
    # leading "parallel" batch-half grid axis (worthwhile for B >= 16).
    logits_p, h_n, c_n = pl.pallas_call(
        _lstm_chunk_kernel,
        out_shape=(
            jax.ShapeDtypeStruct((B, T, Vp), jnp.float32),
            jax.ShapeDtypeStruct((B, H), jnp.float32),
            jax.ShapeDtypeStruct((B, H), jnp.float32),
        ),
        grid_spec=pltpu.PrefetchScalarGridSpec(
            num_scalar_prefetch=0,
            grid=(num_chunks,),
            in_specs=[
                pl.BlockSpec((Tc, B, 4 * H), lambda t: (t, 0, 0)),   # gates_in
                pl.BlockSpec((B, H), const2),                        # h0
                pl.BlockSpec((B, H), const2),                        # c0
                pl.BlockSpec((H, 4 * H), const2),                    # w_hh (fused)
                pl.BlockSpec((H, Vp), const2),                       # w_fc (padded)
                pl.BlockSpec((1, Vp), const2),                       # b_fc (padded)
            ],
            out_specs=[
                pl.BlockSpec((B, Tc, Vp), lambda t: (0, t, 0)),      # logits
                pl.BlockSpec((B, H), const2),                        # h_n (carry)
                pl.BlockSpec((B, H), const2),                        # c_n (carry)
            ],
            scratch_shapes=[
                pltpu.VMEM((Tc, B, H), jnp.float32),                 # h_t staging
            ],
        ),
        compiler_params=pltpu.CompilerParams(
            dimension_semantics=("arbitrary",),      # time recurrence is serial
            vmem_limit_bytes=vmem_limit,
        ),
    )(gates_in, h0, c0, w_hh, w_fc_p, b_fc_p)

    logits = logits_p[..., :V] if Vp != V else logits_p          # (B, T, V)
    return logits, (h_n[None], c_n[None])


# --------------------------------------------------------------------------- #
# Pure-JAX reference + params
# --------------------------------------------------------------------------- #
def _reference_forward(tokens, hidden, params):
    """Pure-JAX reference of the same forward pass (for correctness check)."""
    emb = jnp.take(params["embedding"], tokens, axis=0)           # (B, T, E)
    H = params["w_hh"].shape[0]
    h, c = hidden[0][0], hidden[1][0]

    def step(carry, x_t):
        h, c = carry
        gates = x_t @ params["w_ih"] + h @ params["w_hh"] + params["b"]
        i = jax.nn.sigmoid(gates[:, 0 * H:1 * H])
        f = jax.nn.sigmoid(gates[:, 1 * H:2 * H])
        g = jnp.tanh(gates[:, 2 * H:3 * H])
        o = jax.nn.sigmoid(gates[:, 3 * H:4 * H])
        c = f * c + i * g
        h = o * jnp.tanh(c)
        return (h, c), h

    (h, c), hs = jax.lax.scan(step, (h, c), jnp.transpose(emb, (1, 0, 2)))
    out = jnp.transpose(hs, (1, 0, 2))                            # (B, T, H)
    logits = out @ params["w_fc"] + params["b_fc"]
    return logits, (h[None], c[None])


def init_params(key, vocab_size, embedding_dim, hidden_dim):
    ks = jax.random.split(key, 6)
    s = 0.1
    return {
        "embedding": s * jax.random.normal(ks[0], (vocab_size, embedding_dim), jnp.float32),
        "w_ih": s * jax.random.normal(ks[1], (embedding_dim, 4 * hidden_dim), jnp.float32),
        "w_hh": s * jax.random.normal(ks[2], (hidden_dim, 4 * hidden_dim), jnp.float32),
        "b": s * jax.random.normal(ks[3], (1, 4 * hidden_dim), jnp.float32),
        "w_fc": s * jax.random.normal(ks[4], (hidden_dim, vocab_size), jnp.float32),
        "b_fc": s * jax.random.normal(ks[5], (1, vocab_size), jnp.float32),
    }


if __name__ == "__main__":
    vocab_size, embedding_dim, hidden_dim = 64, 32, 32
    batch, seq = 2, 8

    key = jax.random.PRNGKey(0)
    k_tok, k_par = jax.random.split(key)
    tokens = jax.random.randint(k_tok, (batch, seq), 0, vocab_size, dtype=jnp.int32)
    params = init_params(k_par, vocab_size, embedding_dim, hidden_dim)

    # Generator.init_hidden(batch, device): zeros of shape (1, B, H)
    hidden = (jnp.zeros((1, batch, hidden_dim), jnp.float32),
              jnp.zeros((1, batch, hidden_dim), jnp.float32))

    logits, (h_n, c_n) = generator_forward(tokens, hidden, params)
    jax.block_until_ready((logits, h_n, c_n))

    ref_logits, (ref_h, ref_c) = _reference_forward(tokens, hidden, params)
    assert logits.shape == (batch, seq, vocab_size)
    assert h_n.shape == (1, batch, hidden_dim) and c_n.shape == (1, batch, hidden_dim)
    # FC uses bf16 MXU operands (f32 accumulate) -> bf16-level tolerance on the
    # logits; the recurrence / state stay f32 and match tightly.
    assert jnp.allclose(logits, ref_logits, atol=1e-2, rtol=1e-2)
    assert jnp.allclose(h_n, ref_h, atol=1e-4, rtol=1e-4)
    assert jnp.allclose(c_n, ref_c, atol=1e-4, rtol=1e-4)

    print("KERNEL_OK")
</pallas_src>

<mosaic_0001>
module attributes {stable_mosaic.version = 11 : i64} {
  func.func @_lstm_chunk_kernel(%arg0: i32, %arg1: memref<8x2x128xf32, #tpu.memory_space<vmem>>, %arg2: memref<2x32xf32, #tpu.memory_space<vmem>>, %arg3: memref<2x32xf32, #tpu.memory_space<vmem>>, %arg4: memref<32x128xf32, #tpu.memory_space<vmem>>, %arg5: memref<32x128xbf16, #tpu.memory_space<vmem>>, %arg6: memref<1x128xf32, #tpu.memory_space<vmem>>, %arg7: memref<2x8x128xf32, #tpu.memory_space<vmem>>, %arg8: memref<2x32xf32, #tpu.memory_space<vmem>>, %arg9: memref<2x32xf32, #tpu.memory_space<vmem>>, %arg10: memref<8x2x32xf32, #tpu.memory_space<vmem>>) attributes {dimension_semantics = [#tpu.dimension_semantics<arbitrary>], iteration_bounds = array<i64: 1>, scalar_prefetch = 0 : i64, scratch_operands = 1 : i64, tpu.core_type = #tpu.core_type<tc>, window_params = [{transform_indices = @transform_0, window_bounds = array<i64: 8, 2, 128>}, {pipeline_mode = #tpu.pipeline_mode<synchronous>, transform_indices = @transform_1, window_bounds = array<i64: 2, 32>}, {pipeline_mode = #tpu.pipeline_mode<synchronous>, transform_indices = @transform_2, window_bounds = array<i64: 2, 32>}, {pipeline_mode = #tpu.pipeline_mode<synchronous>, transform_indices = @transform_3, window_bounds = array<i64: 32, 128>}, {pipeline_mode = #tpu.pipeline_mode<synchronous>, transform_indices = @transform_4, window_bounds = array<i64: 32, 128>}, {pipeline_mode = #tpu.pipeline_mode<synchronous>, transform_indices = @transform_5, window_bounds = array<i64: 1, 128>}, {transform_indices = @transform_6, window_bounds = array<i64: 2, 8, 128>}, {pipeline_mode = #tpu.pipeline_mode<synchronous>, transform_indices = @transform_7, window_bounds = array<i64: 2, 32>}, {pipeline_mode = #tpu.pipeline_mode<synchronous>, transform_indices = @transform_8, window_bounds = array<i64: 2, 32>}]} {
    %c0_i32 = arith.constant 0 : i32
    %0 = arith.cmpi eq, %arg0, %c0_i32 : i32
    %1 = arith.extui %0 : i1 to i32
    %c0_i32_0 = arith.constant 0 : i32
    %2 = arith.cmpi ne, %1, %c0_i32_0 : i32
    scf.if %2 {
      %c0_69 = arith.constant 0 : index
      %c0_70 = arith.constant 0 : index
      %225 = vector.load %arg2[%c0_69, %c0_70] : memref<2x32xf32, #tpu.memory_space<vmem>>, vector<2x32xf32>
      %c0_71 = arith.constant 0 : index
      %c0_72 = arith.constant 0 : index
      %226 = vector.load %arg8[%c0_71, %c0_72] : memref<2x32xf32, #tpu.memory_space<vmem>>, vector<2x32xf32>
      tpu.vector_store %arg8[%c0_71, %c0_72], %225 {strides = array<i32>} : memref<2x32xf32, #tpu.memory_space<vmem>>, vector<2x32xf32>,
      %c0_73 = arith.constant 0 : index
      %c0_74 = arith.constant 0 : index
      %227 = vector.load %arg3[%c0_73, %c0_74] : memref<2x32xf32, #tpu.memory_space<vmem>>, vector<2x32xf32>
      %c0_75 = arith.constant 0 : index
      %c0_76 = arith.constant 0 : index
      %228 = vector.load %arg9[%c0_75, %c0_76] : memref<2x32xf32, #tpu.memory_space<vmem>>, vector<2x32xf32>
      tpu.vector_store %arg9[%c0_75, %c0_76], %227 {strides = array<i32>} : memref<2x32xf32, #tpu.memory_space<vmem>>, vector<2x32xf32>,
    } else {
    }
    %c0 = arith.constant 0 : index
    %c0_1 = arith.constant 0 : index
    %3 = vector.load %arg4[%c0, %c0_1] : memref<32x128xf32, #tpu.memory_space<vmem>>, vector<32x128xf32>
    %4 = tpu.iota {dimensions = array<i32: 1>} : vector<2x128xi32>
    %c64_i32 = arith.constant 64 : i32
    %5 = vector.broadcast %c64_i32 : i32 to vector<2x128xi32>
    %6 = arith.cmpi sge, %4, %5 : vector<2x128xi32>
    %c96_i32 = arith.constant 96 : i32
    %7 = vector.broadcast %c96_i32 : i32 to vector<2x128xi32>
    %8 = arith.cmpi slt, %4, %7 : vector<2x128xi32>
    %9 = arith.andi %6, %8 : vector<2x128xi1>
    %c0_2 = arith.constant 0 : index
    %c0_3 = arith.constant 0 : index
    %10 = vector.load %arg8[%c0_2, %c0_3] : memref<2x32xf32, #tpu.memory_space<vmem>>, vector<2x32xf32>
    %c0_4 = arith.constant 0 : index
    %c0_5 = arith.constant 0 : index
    %11 = vector.load %arg9[%c0_4, %c0_5] : memref<2x32xf32, #tpu.memory_space<vmem>>, vector<2x32xf32>
    %c0_i32_6 = arith.constant 0 : i32
    %12 = arith.index_cast %c0_i32_6 : i32 to index
    %c0_7 = arith.constant 0 : index
    %c0_8 = arith.constant 0 : index
    %13 = vector.load %arg1[%12, %c0_7, %c0_8] : memref<8x2x128xf32, #tpu.memory_space<vmem>>, vector<1x2x128xf32>
    %14 = vector.shape_cast %13 : vector<1x2x128xf32> to vector<2x128xf32>
    %cst = arith.constant dense<0.000000e+00> : vector<2x128xf32>
    %15 = tpu.matmul %10, %3, %cst {dimension_numbers = #tpu.dot_dimension_numbers<[1], [0], [0], [1], [0, 0, 1, 1], [], []>} : vector<2x32xf32>, vector<32x128xf32>, vector<2x128xf32> -> vector<2x128xf32>
    %16 = arith.addf %14, %15 : vector<2x128xf32>
    %17 = math.tanh %16 : vector<2x128xf32>
    %18 = arith.negf %16 : vector<2x128xf32>
    %19 = math.exp %18 : vector<2x128xf32>
    %cst_9 = arith.constant 1.000000e+00 : f32
    %20 = vector.broadcast %cst_9 : f32 to vector<2x128xf32>
    %21 = arith.addf %20, %19 : vector<2x128xf32>
    %22 = arith.divf %20, %21 : vector<2x128xf32>
    %23 = arith.select %9, %17, %22 : vector<2x128xi1>, vector<2x128xf32>
    %24 = vector.extract_strided_slice %23 {offsets = [0, 0], sizes = [2, 32], strides = [1, 1]} : vector<2x128xf32> to vector<2x32xf32>
    %25 = vector.extract_strided_slice %23 {offsets = [0, 32], sizes = [2, 32], strides = [1, 1]} : vector<2x128xf32> to vector<2x32xf32>
    %26 = vector.extract_strided_slice %23 {offsets = [0, 64], sizes = [2, 32], strides = [1, 1]} : vector<2x128xf32> to vector<2x32xf32>
    %27 = vector.extract_strided_slice %23 {offsets = [0, 96], sizes = [2, 32], strides = [1, 1]} : vector<2x128xf32> to vector<2x32xf32>
    %28 = arith.mulf %25, %11 : vector<2x32xf32>
    %29 = arith.mulf %24, %26 : vector<2x32xf32>
    %30 = arith.addf %28, %29 : vector<2x32xf32>
    %31 = math.tanh %30 : vector<2x32xf32>
    %32 = arith.mulf %27, %31 : vector<2x32xf32>
    %33 = arith.index_cast %c0_i32_6 : i32 to index
    %c0_10 = arith.constant 0 : index
    %c0_11 = arith.constant 0 : index
    %34 = vector.load %arg10[%33, %c0_10, %c0_11] : memref<8x2x32xf32, #tpu.memory_space<vmem>>, vector<1x2x32xf32>
    %35 = vector.shape_cast %34 : vector<1x2x32xf32> to vector<2x32xf32>
    %36 = vector.shape_cast %32 : vector<2x32xf32> to vector<1x2x32xf32>
    tpu.vector_store %arg10[%33, %c0_10, %c0_11], %36 {strides = array<i32>} : memref<8x2x32xf32, #tpu.memory_space<vmem>>, vector<1x2x32xf32>,
    %c1_i32 = arith.constant 1 : i32
    %37 = arith.index_cast %c1_i32 : i32 to index
    %c0_12 = arith.constant 0 : index
    %c0_13 = arith.constant 0 : index
    %38 = vector.load %arg1[%37, %c0_12, %c0_13] : memref<8x2x128xf32, #tpu.memory_space<vmem>>, vector<1x2x128xf32>
    %39 = vector.shape_cast %38 : vector<1x2x128xf32> to vector<2x128xf32>
    %cst_14 = arith.constant dense<0.000000e+00> : vector<2x128xf32>
    %40 = tpu.matmul %32, %3, %cst_14 {dimension_numbers = #tpu.dot_dimension_numbers<[1], [0], [0], [1], [0, 0, 1, 1], [], []>} : vector<2x32xf32>, vector<32x128xf32>, vector<2x128xf32> -> vector<2x128xf32>
    %41 = arith.addf %39, %40 : vector<2x128xf32>
    %42 = math.tanh %41 : vector<2x128xf32>
    %43 = arith.negf %41 : vector<2x128xf32>
    %44 = math.exp %43 : vector<2x128xf32>
    %cst_15 = arith.constant 1.000000e+00 : f32
    %45 = vector.broadcast %cst_15 : f32 to vector<2x128xf32>
    %46 = arith.addf %45, %44 : vector<2x128xf32>
    %47 = arith.divf %45, %46 : vector<2x128xf32>
    %48 = arith.select %9, %42, %47 : vector<2x128xi1>, vector<2x128xf32>
    %49 = vector.extract_strided_slice %48 {offsets = [0, 0], sizes = [2, 32], strides = [1, 1]} : vector<2x128xf32> to vector<2x32xf32>
    %50 = vector.extract_strided_slice %48 {offsets = [0, 32], sizes = [2, 32], strides = [1, 1]} : vector<2x128xf32> to vector<2x32xf32>
    %51 = vector.extract_strided_slice %48 {offsets = [0, 64], sizes = [2, 32], strides = [1, 1]} : vector<2x128xf32> to vector<2x32xf32>
    %52 = vector.extract_strided_slice %48 {offsets = [0, 96], sizes = [2, 32], strides = [1, 1]} : vector<2x128xf32> to vector<2x32xf32>
    %53 = arith.mulf %50, %30 : vector<2x32xf32>
    %54 = arith.mulf %49, %51 : vector<2x32xf32>
    %55 = arith.addf %53, %54 : vector<2x32xf32>
    %56 = math.tanh %55 : vector<2x32xf32>
    %57 = arith.mulf %52, %56 : vector<2x32xf32>
    %58 = arith.index_cast %c1_i32 : i32 to index
    %c0_16 = arith.constant 0 : index
    %c0_17 = arith.constant 0 : index
    %59 = vector.load %arg10[%58, %c0_16, %c0_17] : memref<8x2x32xf32, #tpu.memory_space<vmem>>, vector<1x2x32xf32>
    %60 = vector.shape_cast %59 : vector<1x2x32xf32> to vector<2x32xf32>
    %61 = vector.shape_cast %57 : vector<2x32xf32> to vector<1x2x32xf32>
    tpu.vector_store %arg10[%58, %c0_16, %c0_17], %61 {strides = array<i32>} : memref<8x2x32xf32, #tpu.memory_space<vmem>>, vector<1x2x32xf32>,
    %c2_i32 = arith.constant 2 : i32
    %62 = arith.index_cast %c2_i32 : i32 to index
    %c0_18 = arith.constant 0 : index
    %c0_19 = arith.constant 0 : index
    %63 = vector.load %arg1[%62, %c0_18, %c0_19] : memref<8x2x128xf32, #tpu.memory_space<vmem>>, vector<1x2x128xf32>
    %64 = vector.shape_cast %63 : vector<1x2x128xf32> to vector<2x128xf32>
    %cst_20 = arith.constant dense<0.000000e+00> : vector<2x128xf32>
    %65 = tpu.matmul %57, %3, %cst_20 {dimension_numbers = #tpu.dot_dimension_numbers<[1], [0], [0], [1], [0, 0, 1, 1], [], []>} : vector<2x32xf32>, vector<32x128xf32>, vector<2x128xf32> -> vector<2x128xf32>
    %66 = arith.addf %64, %65 : vector<2x128xf32>
    %67 = math.tanh %66 : vector<2x128xf32>
    %68 = arith.negf %66 : vector<2x128xf32>
    %69 = math.exp %68 : vector<2x128xf32>
    %cst_21 = arith.constant 1.000000e+00 : f32
    %70 = vector.broadcast %cst_21 : f32 to vector<2x128xf32>
    %71 = arith.addf %70, %69 : vector<2x128xf32>
    %72 = arith.divf %70, %71 : vector<2x128xf32>
    %73 = arith.select %9, %67, %72 : vector<2x128xi1>, vector<2x128xf32>
    %74 = vector.extract_strided_slice %73 {offsets = [0, 0], sizes = [2, 32], strides = [1, 1]} : vector<2x128xf32> to vector<2x32xf32>
    %75 = vector.extract_strided_slice %73 {offsets = [0, 32], sizes = [2, 32], strides = [1, 1]} : vector<2x128xf32> to vector<2x32xf32>
    %76 = vector.extract_strided_slice %73 {offsets = [0, 64], sizes = [2, 32], strides = [1, 1]} : vector<2x128xf32> to vector<2x32xf32>
    %77 = vector.extract_strided_slice %73 {offsets = [0, 96], sizes = [2, 32], strides = [1, 1]} : vector<2x128xf32> to vector<2x32xf32>
    %78 = arith.mulf %75, %55 : vector<2x32xf32>
    %79 = arith.mulf %74, %76 : vector<2x32xf32>
    %80 = arith.addf %78, %79 : vector<2x32xf32>
    %81 = math.tanh %80 : vector<2x32xf32>
    %82 = arith.mulf %77, %81 : vector<2x32xf32>
    %83 = arith.index_cast %c2_i32 : i32 to index
    %c0_22 = arith.constant 0 : index
    %c0_23 = arith.constant 0 : index
    %84 = vector.load %arg10[%83, %c0_22, %c0_23] : memref<8x2x32xf32, #tpu.memory_space<vmem>>, vector<1x2x32xf32>
    %85 = vector.shape_cast %84 : vector<1x2x32xf32> to vector<2x32xf32>
    %86 = vector.shape_cast %82 : vector<2x32xf32> to vector<1x2x32xf32>
    tpu.vector_store %arg10[%83, %c0_22, %c0_23], %86 {strides = array<i32>} : memref<8x2x32xf32, #tpu.memory_space<vmem>>, vector<1x2x32xf32>,
    %c3_i32 = arith.constant 3 : i32
    %87 = arith.index_cast %c3_i32 : i32 to index
    %c0_24 = arith.constant 0 : index
    %c0_25 = arith.constant 0 : index
    %88 = vector.load %arg1[%87, %c0_24, %c0_25] : memref<8x2x128xf32, #tpu.memory_space<vmem>>, vector<1x2x128xf32>
    %89 = vector.shape_cast %88 : vector<1x2x128xf32> to vector<2x128xf32>
    %cst_26 = arith.constant dense<0.000000e+00> : vector<2x128xf32>
    %90 = tpu.matmul %82, %3, %cst_26 {dimension_numbers = #tpu.dot_dimension_numbers<[1], [0], [0], [1], [0, 0, 1, 1], [], []>} : vector<2x32xf32>, vector<32x128xf32>, vector<2x128xf32> -> vector<2x128xf32>
    %91 = arith.addf %89, %90 : vector<2x128xf32>
    %92 = math.tanh %91 : vector<2x128xf32>
    %93 = arith.negf %91 : vector<2x128xf32>
    %94 = math.exp %93 : vector<2x128xf32>
    %cst_27 = arith.constant 1.000000e+00 : f32
    %95 = vector.broadcast %cst_27 : f32 to vector<2x128xf32>
    %96 = arith.addf %95, %94 : vector<2x128xf32>
    %97 = arith.divf %95, %96 : vector<2x128xf32>
    %98 = arith.select %9, %92, %97 : vector<2x128xi1>, vector<2x128xf32>
    %99 = vector.extract_strided_slice %98 {offsets = [0, 0], sizes = [2, 32], strides = [1, 1]} : vector<2x128xf32> to vector<2x32xf32>
    %100 = vector.extract_strided_slice %98 {offsets = [0, 32], sizes = [2, 32], strides = [1, 1]} : vector<2x128xf32> to vector<2x32xf32>
    %101 = vector.extract_strided_slice %98 {offsets = [0, 64], sizes = [2, 32], strides = [1, 1]} : vector<2x128xf32> to vector<2x32xf32>
    %102 = vector.extract_strided_slice %98 {offsets = [0, 96], sizes = [2, 32], strides = [1, 1]} : vector<2x128xf32> to vector<2x32xf32>
    %103 = arith.mulf %100, %80 : vector<2x32xf32>
    %104 = arith.mulf %99, %101 : vector<2x32xf32>
    %105 = arith.addf %103, %104 : vector<2x32xf32>
    %106 = math.tanh %105 : vector<2x32xf32>
    %107 = arith.mulf %102, %106 : vector<2x32xf32>
    %108 = arith.index_cast %c3_i32 : i32 to index
    %c0_28 = arith.constant 0 : index
    %c0_29 = arith.constant 0 : index
    %109 = vector.load %arg10[%108, %c0_28, %c0_29] : memref<8x2x32xf32, #tpu.memory_space<vmem>>, vector<1x2x32xf32>
    %110 = vector.shape_cast %109 : vector<1x2x32xf32> to vector<2x32xf32>
    %111 = vector.shape_cast %107 : vector<2x32xf32> to vector<1x2x32xf32>
    tpu.vector_store %arg10[%108, %c0_28, %c0_29], %111 {strides = array<i32>} : memref<8x2x32xf32, #tpu.memory_space<vmem>>, vector<1x2x32xf32>,
    %c4_i32 = arith.constant 4 : i32
    %112 = arith.index_cast %c4_i32 : i32 to index
    %c0_30 = arith.constant 0 : index
    %c0_31 = arith.constant 0 : index
    %113 = vector.load %arg1[%112, %c0_30, %c0_31] : memref<8x2x128xf32, #tpu.memory_space<vmem>>, vector<1x2x128xf32>
    %114 = vector.shape_cast %113 : vector<1x2x128xf32> to vector<2x128xf32>
    %cst_32 = arith.constant dense<0.000000e+00> : vector<2x128xf32>
    %115 = tpu.matmul %107, %3, %cst_32 {dimension_numbers = #tpu.dot_dimension_numbers<[1], [0], [0], [1], [0, 0, 1, 1], [], []>} : vector<2x32xf32>, vector<32x128xf32>, vector<2x128xf32> -> vector<2x128xf32>
    %116 = arith.addf %114, %115 : vector<2x128xf32>
    %117 = math.tanh %116 : vector<2x128xf32>
    %118 = arith.negf %116 : vector<2x128xf32>
    %119 = math.exp %118 : vector<2x128xf32>
    %cst_33 = arith.constant 1.000000e+00 : f32
    %120 = vector.broadcast %cst_33 : f32 to vector<2x128xf32>
    %121 = arith.addf %120, %119 : vector<2x128xf32>
    %122 = arith.divf %120, %121 : vector<2x128xf32>
    %123 = arith.select %9, %117, %122 : vector<2x128xi1>, vector<2x128xf32>
    %124 = vector.extract_strided_slice %123 {offsets = [0, 0], sizes = [2, 32], strides = [1, 1]} : vector<2x128xf32> to vector<2x32xf32>
    %125 = vector.extract_strided_slice %123 {offsets = [0, 32], sizes = [2, 32], strides = [1, 1]} : vector<2x128xf32> to vector<2x32xf32>
    %126 = vector.extract_strided_slice %123 {offsets = [0, 64], sizes = [2, 32], strides = [1, 1]} : vector<2x128xf32> to vector<2x32xf32>
    %127 = vector.extract_strided_slice %123 {offsets = [0, 96], sizes = [2, 32], strides = [1, 1]} : vector<2x128xf32> to vector<2x32xf32>
    %128 = arith.mulf %125, %105 : vector<2x32xf32>
    %129 = arith.mulf %124, %126 : vector<2x32xf32>
    %130 = arith.addf %128, %129 : vector<2x32xf32>
    %131 = math.tanh %130 : vector<2x32xf32>
    %132 = arith.mulf %127, %131 : vector<2x32xf32>
    %133 = arith.index_cast %c4_i32 : i32 to index
    %c0_34 = arith.constant 0 : index
    %c0_35 = arith.constant 0 : index
    %134 = vector.load %arg10[%133, %c0_34, %c0_35] : memref<8x2x32xf32, #tpu.memory_space<vmem>>, vector<1x2x32xf32>
    %135 = vector.shape_cast %134 : vector<1x2x32xf32> to vector<2x32xf32>
    %136 = vector.shape_cast %132 : vector<2x32xf32> to vector<1x2x32xf32>
    tpu.vector_store %arg10[%133, %c0_34, %c0_35], %136 {strides = array<i32>} : memref<8x2x32xf32, #tpu.memory_space<vmem>>, vector<1x2x32xf32>,
    %c5_i32 = arith.constant 5 : i32
    %137 = arith.index_cast %c5_i32 : i32 to index
    %c0_36 = arith.constant 0 : index
    %c0_37 = arith.constant 0 : index
    %138 = vector.load %arg1[%137, %c0_36, %c0_37] : memref<8x2x128xf32, #tpu.memory_space<vmem>>, vector<1x2x128xf32>
    %139 = vector.shape_cast %138 : vector<1x2x128xf32> to vector<2x128xf32>
    %cst_38 = arith.constant dense<0.000000e+00> : vector<2x128xf32>
    %140 = tpu.matmul %132, %3, %cst_38 {dimension_numbers = #tpu.dot_dimension_numbers<[1], [0], [0], [1], [0, 0, 1, 1], [], []>} : vector<2x32xf32>, vector<32x128xf32>, vector<2x128xf32> -> vector<2x128xf32>
    %141 = arith.addf %139, %140 : vector<2x128xf32>
    %142 = math.tanh %141 : vector<2x128xf32>
    %143 = arith.negf %141 : vector<2x128xf32>
    %144 = math.exp %143 : vector<2x128xf32>
    %cst_39 = arith.constant 1.000000e+00 : f32
    %145 = vector.broadcast %cst_39 : f32 to vector<2x128xf32>
    %146 = arith.addf %145, %144 : vector<2x128xf32>
    %147 = arith.divf %145, %146 : vector<2x128xf32>
    %148 = arith.select %9, %142, %147 : vector<2x128xi1>, vector<2x128xf32>
    %149 = vector.extract_strided_slice %148 {offsets = [0, 0], sizes = [2, 32], strides = [1, 1]} : vector<2x128xf32> to vector<2x32xf32>
    %150 = vector.extract_strided_slice %148 {offsets = [0, 32], sizes = [2, 32], strides = [1, 1]} : vector<2x128xf32> to vector<2x32xf32>
    %151 = vector.extract_strided_slice %148 {offsets = [0, 64], sizes = [2, 32], strides = [1, 1]} : vector<2x128xf32> to vector<2x32xf32>
    %152 = vector.extract_strided_slice %148 {offsets = [0, 96], sizes = [2, 32], strides = [1, 1]} : vector<2x128xf32> to vector<2x32xf32>
    %153 = arith.mulf %150, %130 : vector<2x32xf32>
    %154 = arith.mulf %149, %151 : vector<2x32xf32>
    %155 = arith.addf %153, %154 : vector<2x32xf32>
    %156 = math.tanh %155 : vector<2x32xf32>
    %157 = arith.mulf %152, %156 : vector<2x32xf32>
    %158 = arith.index_cast %c5_i32 : i32 to index
    %c0_40 = arith.constant 0 : index
    %c0_41 = arith.constant 0 : index
    %159 = vector.load %arg10[%158, %c0_40, %c0_41] : memref<8x2x32xf32, #tpu.memory_space<vmem>>, vector<1x2x32xf32>
    %160 = vector.shape_cast %159 : vector<1x2x32xf32> to vector<2x32xf32>
    %161 = vector.shape_cast %157 : vector<2x32xf32> to vector<1x2x32xf32>
    tpu.vector_store %arg10[%158, %c0_40, %c0_41], %161 {strides = array<i32>} : memref<8x2x32xf32, #tpu.memory_space<vmem>>, vector<1x2x32xf32>,
    %c6_i32 = arith.constant 6 : i32
    %162 = arith.index_cast %c6_i32 : i32 to index
    %c0_42 = arith.constant 0 : index
    %c0_43 = arith.constant 0 : index
    %163 = vector.load %arg1[%162, %c0_42, %c0_43] : memref<8x2x128xf32, #tpu.memory_space<vmem>>, vector<1x2x128xf32>
    %164 = vector.shape_cast %163 : vector<1x2x128xf32> to vector<2x128xf32>
    %cst_44 = arith.constant dense<0.000000e+00> : vector<2x128xf32>
    %165 = tpu.matmul %157, %3, %cst_44 {dimension_numbers = #tpu.dot_dimension_numbers<[1], [0], [0], [1], [0, 0, 1, 1], [], []>} : vector<2x32xf32>, vector<32x128xf32>, vector<2x128xf32> -> vector<2x128xf32>
    %166 = arith.addf %164, %165 : vector<2x128xf32>
    %167 = math.tanh %166 : vector<2x128xf32>
    %168 = arith.negf %166 : vector<2x128xf32>
    %169 = math.exp %168 : vector<2x128xf32>
    %cst_45 = arith.constant 1.000000e+00 : f32
    %170 = vector.broadcast %cst_45 : f32 to vector<2x128xf32>
    %171 = arith.addf %170, %169 : vector<2x128xf32>
    %172 = arith.divf %170, %171 : vector<2x128xf32>
    %173 = arith.select %9, %167, %172 : vector<2x128xi1>, vector<2x128xf32>
    %174 = vector.extract_strided_slice %173 {offsets = [0, 0], sizes = [2, 32], strides = [1, 1]} : vector<2x128xf32> to vector<2x32xf32>
    %175 = vector.extract_strided_slice %173 {offsets = [0, 32], sizes = [2, 32], strides = [1, 1]} : vector<2x128xf32> to vector<2x32xf32>
    %176 = vector.extract_strided_slice %173 {offsets = [0, 64], sizes = [2, 32], strides = [1, 1]} : vector<2x128xf32> to vector<2x32xf32>
    %177 = vector.extract_strided_slice %173 {offsets = [0, 96], sizes = [2, 32], strides = [1, 1]} : vector<2x128xf32> to vector<2x32xf32>
    %178 = arith.mulf %175, %155 : vector<2x32xf32>
    %179 = arith.mulf %174, %176 : vector<2x32xf32>
    %180 = arith.addf %178, %179 : vector<2x32xf32>
    %181 = math.tanh %180 : vector<2x32xf32>
    %182 = arith.mulf %177, %181 : vector<2x32xf32>
    %183 = arith.index_cast %c6_i32 : i32 to index
    %c0_46 = arith.constant 0 : index
    %c0_47 = arith.constant 0 : index
    %184 = vector.load %arg10[%183, %c0_46, %c0_47] : memref<8x2x32xf32, #tpu.memory_space<vmem>>, vector<1x2x32xf32>
    %185 = vector.shape_cast %184 : vector<1x2x32xf32> to vector<2x32xf32>
    %186 = vector.shape_cast %182 : vector<2x32xf32> to vector<1x2x32xf32>
    tpu.vector_store %arg10[%183, %c0_46, %c0_47], %186 {strides = array<i32>} : memref<8x2x32xf32, #tpu.memory_space<vmem>>, vector<1x2x32xf32>,
    %c7_i32 = arith.constant 7 : i32
    %187 = arith.index_cast %c7_i32 : i32 to index
    %c0_48 = arith.constant 0 : index
    %c0_49 = arith.constant 0 : index
    %188 = vector.load %arg1[%187, %c0_48, %c0_49] : memref<8x2x128xf32, #tpu.memory_space<vmem>>, vector<1x2x128xf32>
    %189 = vector.shape_cast %188 : vector<1x2x128xf32> to vector<2x128xf32>
    %cst_50 = arith.constant dense<0.000000e+00> : vector<2x128xf32>
    %190 = tpu.matmul %182, %3, %cst_50 {dimension_numbers = #tpu.dot_dimension_numbers<[1], [0], [0], [1], [0, 0, 1, 1], [], []>} : vector<2x32xf32>, vector<32x128xf32>, vector<2x128xf32> -> vector<2x128xf32>
    %191 = arith.addf %189, %190 : vector<2x128xf32>
    %192 = math.tanh %191 : vector<2x128xf32>
    %193 = arith.negf %191 : vector<2x128xf32>
    %194 = math.exp %193 : vector<2x128xf32>
    %cst_51 = arith.constant 1.000000e+00 : f32
    %195 = vector.broadcast %cst_51 : f32 to vector<2x128xf32>
    %196 = arith.addf %195, %194 : vector<2x128xf32>
    %197 = arith.divf %195, %196 : vector<2x128xf32>
    %198 = arith.select %9, %192, %197 : vector<2x128xi1>, vector<2x128xf32>
    %199 = vector.extract_strided_slice %198 {offsets = [0, 0], sizes = [2, 32], strides = [1, 1]} : vector<2x128xf32> to vector<2x32xf32>
    %200 = vector.extract_strided_slice %198 {offsets = [0, 32], sizes = [2, 32], strides = [1, 1]} : vector<2x128xf32> to vector<2x32xf32>
    %201 = vector.extract_strided_slice %198 {offsets = [0, 64], sizes = [2, 32], strides = [1, 1]} : vector<2x128xf32> to vector<2x32xf32>
    %202 = vector.extract_strided_slice %198 {offsets = [0, 96], sizes = [2, 32], strides = [1, 1]} : vector<2x128xf32> to vector<2x32xf32>
    %203 = arith.mulf %200, %180 : vector<2x32xf32>
    %204 = arith.mulf %199, %201 : vector<2x32xf32>
    %205 = arith.addf %203, %204 : vector<2x32xf32>
    %206 = math.tanh %205 : vector<2x32xf32>
    %207 = arith.mulf %202, %206 : vector<2x32xf32>
    %208 = arith.index_cast %c7_i32 : i32 to index
    %c0_52 = arith.constant 0 : index
    %c0_53 = arith.constant 0 : index
    %209 = vector.load %arg10[%208, %c0_52, %c0_53] : memref<8x2x32xf32, #tpu.memory_space<vmem>>, vector<1x2x32xf32>
    %210 = vector.shape_cast %209 : vector<1x2x32xf32> to vector<2x32xf32>
    %211 = vector.shape_cast %207 : vector<2x32xf32> to vector<1x2x32xf32>
    tpu.vector_store %arg10[%208, %c0_52, %c0_53], %211 {strides = array<i32>} : memref<8x2x32xf32, #tpu.memory_space<vmem>>, vector<1x2x32xf32>,
    %c8_i32 = arith.constant 8 : i32
    %c0_54 = arith.constant 0 : index
    %c0_55 = arith.constant 0 : index
    %212 = vector.load %arg8[%c0_54, %c0_55] : memref<2x32xf32, #tpu.memory_space<vmem>>, vector<2x32xf32>
    tpu.vector_store %arg8[%c0_54, %c0_55], %207 {strides = array<i32>} : memref<2x32xf32, #tpu.memory_space<vmem>>, vector<2x32xf32>,
    %c0_56 = arith.constant 0 : index
    %c0_57 = arith.constant 0 : index
    %213 = vector.load %arg9[%c0_56, %c0_57] : memref<2x32xf32, #tpu.memory_space<vmem>>, vector<2x32xf32>
    tpu.vector_store %arg9[%c0_56, %c0_57], %205 {strides = array<i32>} : memref<2x32xf32, #tpu.memory_space<vmem>>, vector<2x32xf32>,
    %c0_58 = arith.constant 0 : index
    %c0_59 = arith.constant 0 : index
    %c0_60 = arith.constant 0 : index
    %214 = vector.load %arg10[%c0_58, %c0_59, %c0_60] : memref<8x2x32xf32, #tpu.memory_space<vmem>>, vector<8x2x32xf32>
    %215 = tpu.transpose %214, [1, 0, 2] : vector<8x2x32xf32> -> vector<2x8x32xf32>
    %c0_61 = arith.constant 0 : index
    %c0_62 = arith.constant 0 : index
    %216 = vector.load %arg5[%c0_61, %c0_62] : memref<32x128xbf16, #tpu.memory_space<vmem>>, vector<32x128xbf16>
    %217 = vector.shape_cast %215 : vector<2x8x32xf32> to vector<16x32xf32>
    %218 = arith.truncf %217 : vector<16x32xf32> to vector<16x32xbf16>
    %cst_63 = arith.constant dense<0.000000e+00> : vector<16x128xf32>
    %219 = tpu.matmul %218, %216, %cst_63 {dimension_numbers = #tpu.dot_dimension_numbers<[1], [0], [0], [1], [0, 0, 1, 1], [], []>} : vector<16x32xbf16>, vector<32x128xbf16>, vector<16x128xf32> -> vector<16x128xf32>
    %c0_64 = arith.constant 0 : index
    %c0_65 = arith.constant 0 : index
    %220 = vector.load %arg6[%c0_64, %c0_65] : memref<1x128xf32, #tpu.memory_space<vmem>>, vector<1x128xf32>
    %221 = vector.broadcast %220 : vector<1x128xf32> to vector<16x128xf32>
    %222 = arith.addf %219, %221 : vector<16x128xf32>
    %223 = vector.shape_cast %222 : vector<16x128xf32> to vector<2x8x128xf32>
    %c0_66 = arith.constant 0 : index
    %c0_67 = arith.constant 0 : index
    %c0_68 = arith.constant 0 : index
    %224 = vector.load %arg7[%c0_66, %c0_67, %c0_68] : memref<2x8x128xf32, #tpu.memory_space<vmem>>, vector<2x8x128xf32>
    tpu.vector_store %arg7[%c0_66, %c0_67, %c0_68], %223 {strides = array<i32>} : memref<2x8x128xf32, #tpu.memory_space<vmem>>, vector<2x8x128xf32>,
    return
  }
  func.func @transform_0(%arg0: i32) -> (i32, i32, i32) {
    %c0_i32 = arith.constant 0 : i32
    %c0_i32_0 = arith.constant 0 : i32
    %c0_i32_1 = arith.constant 0 : i32
    return %arg0, %c0_i32, %c0_i32_0 : i32, i32, i32
  }
  func.func @transform_1(%arg0: i32) -> (i32, i32) {
    %c0_i32 = arith.constant 0 : i32
    %c0_i32_0 = arith.constant 0 : i32
    %c0_i32_1 = arith.constant 0 : i32
    return %c0_i32, %c0_i32_0 : i32, i32
  }
  func.func @transform_2(%arg0: i32) -> (i32, i32) {
    %c0_i32 = arith.constant 0 : i32
    %c0_i32_0 = arith.constant 0 : i32
    %c0_i32_1 = arith.constant 0 : i32
    return %c0_i32, %c0_i32_0 : i32, i32
  }
  func.func @transform_3(%arg0: i32) -> (i32, i32) {
    %c0_i32 = arith.constant 0 : i32
    %c0_i32_0 = arith.constant 0 : i32
    %c0_i32_1 = arith.constant 0 : i32
    return %c0_i32, %c0_i32_0 : i32, i32
  }
  func.func @transform_4(%arg0: i32) -> (i32, i32) {
    %c0_i32 = arith.constant 0 : i32
    %c0_i32_0 = arith.constant 0 : i32
    %c0_i32_1 = arith.constant 0 : i32
    return %c0_i32, %c0_i32_0 : i32, i32
  }
  func.func @transform_5(%arg0: i32) -> (i32, i32) {
    %c0_i32 = arith.constant 0 : i32
    %c0_i32_0 = arith.constant 0 : i32
    %c0_i32_1 = arith.constant 0 : i32
    return %c0_i32, %c0_i32_0 : i32, i32
  }
  func.func @transform_6(%arg0: i32) -> (i32, i32, i32) {
    %c0_i32 = arith.constant 0 : i32
    %c0_i32_0 = arith.constant 0 : i32
    %c0_i32_1 = arith.constant 0 : i32
    return %c0_i32, %arg0, %c0_i32_0 : i32, i32, i32
  }
  func.func @transform_7(%arg0: i32) -> (i32, i32) {
    %c0_i32 = arith.constant 0 : i32
    %c0_i32_0 = arith.constant 0 : i32
    %c0_i32_1 = arith.constant 0 : i32
    return %c0_i32, %c0_i32_0 : i32, i32
  }
  func.func @transform_8(%arg0: i32) -> (i32, i32) {
    %c0_i32 = arith.constant 0 : i32
    %c0_i32_0 = arith.constant 0 : i32
    %c0_i32_1 = arith.constant 0 : i32
    return %c0_i32, %c0_i32_0 : i32, i32
  }
}

</mosaic_0001>

<bundles_post_ra>
// kernel: tpu_custom_call.1
= control target key start
LH: loop header
LB: loop body
LE: loop exit
PB: predicated region body
PF: predicated region fallthrough
CT: control target
= control target key end

     0   :  { %14 = vsyncpa [#allocation4], 0  ;;  %s1319_s0 = inlined_call_operand.hbm [shape: f32[8,2,128], index: 0, kind: input, shape index: {}]   ;;  %s1320_s1 = inlined_call_operand.hbm [shape: f32[2,32], index: 1, kind: input, shape index: {}]   ;;  %s1321_s2 = inlined_call_operand.hbm [shape: f32[2,32], index: 2, kind: input, shape index: {}]   ;;  %s1322_s3 = inlined_call_operand.hbm [shape: f32[32,128], index: 3, kind: input, shape index: {}]   ;;  %s1323_s4 = inlined_call_operand.hbm [shape: bf16[32,128], index: 4, kind: input, shape index: {}]   ;;  %s1324_s5 = inlined_call_operand.vmem [shape: f32[1,128], index: 5, kind: input, shape index: {}]   ;;  %s1325_s6 = inlined_call_operand.hbm [shape: f32[2,8,128], index: 6, kind: output, shape index: {0}]   ;;  %s1326_s7 = inlined_call_operand.hbm [shape: f32[2,32], index: 7, kind: output, shape index: {1}]   ;;  %s1327_s8 = inlined_call_operand.hbm [shape: f32[2,32], index: 8, kind: output, shape index: {2}]  }
   0x1   :  { %15 = vsyncpa [#allocation7], 0 }
   0x2   :  { %16 = vsyncpa [#allocation10], 0 }
   0x3   :  { %17 = vsyncpa [#allocation5], 0  ;;  %s37_s29 = sshll.u32 %s1320_s1, 4  ;;  %s38_s29 = int_to_ptr.hbm [resolvable:$true] %s37_s29 }
   0x4   :  { %18 = vsyncpa [#allocation14], 0  ;;  %s1138_s30 = smov [#allocation6]   ;;  %s58_s12 = sshll.u32 %s1322_s3, 4  ;;  %s59_s12 = int_to_ptr.hbm [resolvable:$true] %s58_s12 }
   0x5   :  { %s39_s9 = sshll.u32 %s1138_s30, 4  ;;  %s1139_s13 = smov [#allocation9]   ;;  %s40_s9 = int_to_ptr.vmem [resolvable:$true] %s39_s9 }
   0x6   :  { %42 = dma.hbm_to_vmem [thread:$0]  %s38_s29, 32, %s40_s9, [#allocation7]  }
   0x7   :  { %s60_s14 = sshll.u32 %s1139_s13, 4  ;;  %s1140_s15 = smov 128   ;;  %s61_s14 = int_to_ptr.vmem [resolvable:$true] %s60_s14 }
   0x8   :  { %s1141_s16 = smov 8   ;;  %s23_s18 = sshll.u32 %s1319_s0, 4  ;;  %s24_s18 = int_to_ptr.hbm [resolvable:$true] %s23_s18 }
   0x9   :  { %66 = dma.hbm_to_vmem [thread:$0]  %s59_s12, 512, %s61_s14, [#allocation10], %s1140_s15, %s1140_s15, %s1141_s16  }
   0xa   :  { %s1142_s19 = smov [#allocation3]   ;;  %s48_s22 = sshll.u32 %s1321_s2, 4  ;;  %s49_s22 = int_to_ptr.hbm [resolvable:$true] %s48_s22 }
   0xb   :  { %s25_s20 = sshll.u32 %s1142_s19, 4  ;;  %s1143_s23 = smov 32   ;;  %s26_s20 = int_to_ptr.vmem [resolvable:$true] %s25_s20 }
   0xc   :  { %s1144_s24 = smov 2   ;;  %s1145_s25 = smov [#allocation8]  }
   0xd   :  { %31 = dma.hbm_to_vmem [thread:$0]  %s24_s18, 256, %s26_s20, [#allocation4], %s1143_s23, %s1143_s23, %s1144_s24  }
   0xe   :  { %s50_s26 = sshll.u32 %s1145_s25, 4  ;;  %s71_s0 = sshll.u32 %s1323_s4, 4  ;;  %s51_s26 = int_to_ptr.vmem [resolvable:$true] %s50_s26  ;;  %s72_s0 = int_to_ptr.hbm [resolvable:$true] %s71_s0 }
   0xf   :  { %53 = dma.hbm_to_vmem [thread:$0]  %s49_s22, 32, %s51_s26, [#allocation7]  }
  0x10   :  { %s1146_s29 = smov [#allocation11]   ;;  %s1147_s9 = smov 64  }
  0x11   :  { %s73_s30 = sshll.u32 %s1146_s29, 4  ;;  %s1148_s2 = smov 4   ;;  %s74_s30 = int_to_ptr.vmem [resolvable:$true] %s73_s30 }
  0x12   :  { %79 = dma.hbm_to_vmem [thread:$0]  %s72_s0, 256, %s74_s30, [#allocation10], %s1147_s9, %s1147_s9, %s1148_s2  }
  0x13   :  { %1128 = dma.done.wait [#allocation4], 256  }
  0x14   :  { %1129 = vsyncadd [#allocation4], 4294967040 }
  0x15   :  { %1130 = dma.done.wait [#allocation7], 64  }
  0x16   :  { %1131 = vsyncadd [#allocation7], 4294967232 }
  0x17   :  { %1132 = dma.done.wait [#allocation10], 768  }
  0x18   :  { %1133 = vsyncadd [#allocation10], 4294966528  ;;  %vm108_vm0 = vcmask 254976   ;;  %v115_v0 = vld [vmem:[#allocation9 + $0x18] sm:$0xff]  ;;  %v114_v1 = vld [vmem:[#allocation9 + $0x10] sm:$0xff]  ;;  %vm124_vm1 = vcmask 261120   ;;  %v116_v13 = vlaneseq }
  0x19   :  { %140 = vmatpush.msra.mxu1 %v115_v0  ;;  %v107_v2 = vld [vmem:[#allocation6] sm:$0x3]  ;;  %282 = vmatpush.msra.mxu2 %v115_v0  ;;  %v113_v3 = vld [vmem:[#allocation9 + $0x8] sm:$0xff]  ;;  %v112_v4 = vld [vmem:[#allocation9] sm:$0xff]  ;;  %s1149_s4 = smov 96   ;;  %s1152_s10 = smov [#allocation13]  }
  0x1a   :  { %109 = vst.msk [vmem:[#allocation13] sm:$0x3] %vm108_vm0, %v107_v2  ;;  %351 = vmatpush.msra.mxu3 %v115_v0  ;;  %420 = vmatpush.msra.mxu0 %v115_v0  ;;  %v123_v6 = vld [vmem:[#allocation3] sm:$0x3]  ;;  %v110_v7 = vld [vmem:[#allocation8] sm:$0x3] }
  0x1b   :  { %141 = vmatpush.msra.mxu1 %v114_v1  ;;  %283 = vmatpush.msra.mxu2 %v114_v1  ;;  %111 = vst.msk [vmem:[#allocation15] sm:$0x3] %vm108_vm0, %v110_v7  ;;  %v117_v15 = vand.u32 127, %v116_v13  ;;  %v198_v39 = vld [vmem:[#allocation3 + $0x2] sm:$0x3]  ;;  %s793_s11 = sshll.u32 %s1152_s10, 4  ;;  %s794_s11 = int_to_ptr.vmem [resolvable:$true] %s793_s11 }
  0x1c   :  { %352 = vmatpush.msra.mxu3 %v114_v1  ;;  %421 = vmatpush.msra.mxu0 %v114_v1  ;;  %v267_v2 = vld [vmem:[#allocation3 + $0x4] sm:$0x3]  ;;  %s795_s14 = sshll.u32 %s1326_s7, 4  ;;  %s1153_s1 = smov [#allocation15]   ;;  %s796_s14 = int_to_ptr.hbm [resolvable:$true] %s795_s14 }
  0x1d   :  { %142 = vmatpush.msra.mxu1 %v113_v3  ;;  %284 = vmatpush.msra.mxu2 %v113_v3  ;;  %vm118_vm2 = vcmp.ge.s32.totalorder %v117_v15, 64  ;;  %vm119_vm3 = vcmp.lt.s32.totalorder %v117_v15, 96  ;;  %s804_s17 = sshll.u32 %s1153_s1, 4  ;;  %s806_s20 = sshll.u32 %s1327_s8, 4  ;;  %s805_s17 = int_to_ptr.vmem [resolvable:$true] %s804_s17  ;;  %s807_s20 = int_to_ptr.hbm [resolvable:$true] %s806_s20 }
  0x1e   :  { %353 = vmatpush.msra.mxu3 %v113_v3  ;;  %422 = vmatpush.msra.mxu0 %v113_v3  ;;  %vm1225_vm5 = vmand %vm118_vm2, %vm119_vm3  ;;  %s1154_s7 = smov [#allocation12]   ;;  %s781_s25 = sshll.u32 %s1325_s6, 4  ;;  %s782_s25 = int_to_ptr.hbm [resolvable:$true] %s781_s25 }
  0x1f   :  { %143 = vmatpush.msra.mxu1 %v112_v4  ;;  %285 = vmatpush.msra.mxu2 %v112_v4  ;;  %s779_s22 = sshll.u32 %s1154_s7, 4  ;;  %s780_s22 = int_to_ptr.vmem [resolvable:$true] %s779_s22 }
  0x20   :  { %354 = vmatpush.msra.mxu3 %v112_v4  ;;  %423 = vmatpush.msra.mxu0 %v112_v4 }
  0x21   :  { %213 = vmatpush.msrb.mxu1 %v115_v0  ;;  %v121_v5 = vld [vmem:[#allocation13] sm:$0x3]  ;;  %558 = vmatpush.msrb.mxu2 %v115_v0 }
  0x22   :  { %827 = vmatmul.msk.f32.vlgmr.msra.gmra.mxu1 %vm124_vm1, %v121_v5  ;;  %627 = vmatpush.msrb.mxu3 %v115_v0  ;;  %v122_v28 = vld [vmem:[#allocation15] sm:$0x3] }
  0x23   :  { %214 = vmatpush.msrb.mxu1 %v114_v1  ;;  %559 = vmatpush.msrb.mxu2 %v114_v1 }
  0x24   :  { %628 = vmatpush.msrb.mxu3 %v114_v1 }
  0x25   :  { %215 = vmatpush.msrb.mxu1 %v113_v3  ;;  %560 = vmatpush.msrb.mxu2 %v113_v3 }
  0x26   :  { %629 = vmatpush.msrb.mxu3 %v113_v3 }
  0x27   :  { %216 = vmatpush.msrb.mxu1 %v112_v4  ;;  %561 = vmatpush.msrb.mxu2 %v112_v4 }
  0x28   :  { %630 = vmatpush.msrb.mxu3 %v112_v4 }
  0x29   :  { %489 = vmatpush.msra.mxu1 %v115_v0 }
  0x2b   :  { %490 = vmatpush.msra.mxu1 %v114_v1 }
  0x2d   :  { %491 = vmatpush.msra.mxu1 %v113_v3 }
  0x2f   :  { %492 = vmatpush.msra.mxu1 %v112_v4 }
  0x9f   :  { %v145_v8 = vpop.f32.mrf.mxu1 }
  0xa0   :  { %v148_v9 = vadd.f32 %v145_v8, %v123_v6 }
  0xa2   :  { %v828_v10 = vmul.f32 -1.442695, %v148_v9 }
  0xa4   :  { %872 = vpow2.f32 %v828_v10 }
  0xaa   :  { %v873_v11 = vpop.eup %872 }
  0xab   :  { %v153_v12 = vadd.f32 1.0, %v873_v11 }
  0xad   :  { %874 = vrcp.f32 %v153_v12  ;;  %v165_v18 = vand.u32 2147483648, %v153_v12  ;;  %v163_v20 = vand.u32 2147483647, %v153_v12  ;;  %vm159_vm6 = vweird.f32 %v153_v12 }
  0xae   :  { %876 = vtanh.f32 %v148_v9 }
  0xaf   :  { %v166_v23 = vor.u32 1.1754944e-38, %v165_v18  ;;  %vm164_vm8 = vcmp.eq.f32.partialorder %v163_v20, 8.507059e+37 }
  0xb3   :  { %v875_v14 = vpop.eup %874 }
  0xb4   :  { %v155_v16 = vmul.f32 %v875_v14, %v153_v12  ;;  %vm160_vm4 = vweird.f32 %v875_v14  ;;  %v877_v25 = vpop.eup %876 }
  0xb5   :  { %vm161_vm7 = vmor %vm159_vm6, %vm160_vm4 }
  0xb6   :  { %v156_v17 = vsub.f32 1.0, %v155_v16 }
  0xb8   :  { %v157_v19 = vmul.f32 %v875_v14, %v156_v17 }
  0xba   :  { %v158_v22 = vadd.f32 %v875_v14, %v157_v19 }
  0xbc   :  { %v162_v24 = vsel %vm161_vm7, %v875_v14, %v158_v22 }
  0xbd   :  { %v167_v26 = vsel %vm164_vm8, %v166_v23, %v162_v24 }
  0xbe   :  { %v169_v27 = vsel %vm1225_vm5, %v877_v25, %v167_v26 }
  0xbf   :  { %176 = vrot.lane.b32.xlu0 %v169_v27, %s1147_s9 }
  0xc7   :  { %171 = vrot.lane.b32.xlu0 %v122_v28, %s1143_s23 }
 0x131   :  { %v177_v29 = vpop.permute.xlu0 %176 }
 0x132   :  { %v179_v30 = vmul.f32 %v177_v29, %v169_v27 }
 0x134   :  { %181 = vrot.lane.b32.xlu1 %v179_v30, %s1143_s23  ;;  %v336_v30 = vld [vmem:[#allocation3 + $0x6] sm:$0x3] }
 0x139   :  { %v172_v31 = vpop.permute.xlu0 %171 }
 0x13a   :  { %v174_v32 = vmul.f32 %v172_v31, %v169_v27 }
 0x1a6   :  { %v182_v33 = vpop.permute.xlu1 %181 }
 0x1a7   :  { %v184_v34 = vadd.f32 %v182_v33, %v174_v32 }
 0x1a9   :  { %878 = vtanh.f32 %v184_v34 }
 0x1af   :  { %v879_v35 = vpop.eup %878 }
 0x1b0   :  { %187 = vrot.lane.b32.xlu1 %v879_v35, %s1147_s9 }
 0x222   :  { %v188_v36 = vpop.permute.xlu1 %187 }
 0x223   :  { %v190_v37 = vmul.f32 %v188_v36, %v169_v27 }
 0x225   :  { %192 = vrot.lane.b32.xlu2 %v190_v37, %s1143_s23 }
 0x27f   :  { %v193_v38 = vpop.permute.xlu2 %192 }
 0x280   :  { %196 = vst.msk [vmem:[#allocation2] sm:$0x3] %vm108_vm0, %v193_v38  ;;  %829 = vmatmul.msk.f32.vlgmr.msrb.gmra.mxu1 %vm124_vm1, %v193_v38 }
 0x2fd   :  { %v218_v40 = vpop.f32.mrf.mxu1 }
 0x2fe   :  { %v221_v41 = vadd.f32 %v218_v40, %v198_v39 }
 0x300   :  { %v830_v42 = vmul.f32 -1.442695, %v221_v41 }
 0x302   :  { %880 = vpow2.f32 %v830_v42 }
 0x308   :  { %v881_v43 = vpop.eup %880 }
 0x309   :  { %v226_v44 = vadd.f32 1.0, %v881_v43 }
 0x30b   :  { %882 = vrcp.f32 %v226_v44  ;;  %v238_v48 = vand.u32 2147483648, %v226_v44  ;;  %v236_v50 = vand.u32 2147483647, %v226_v44  ;;  %vm232_vm10 = vweird.f32 %v226_v44 }
 0x30c   :  { %884 = vtanh.f32 %v221_v41 }
 0x30d   :  { %v239_v52 = vor.u32 1.1754944e-38, %v238_v48  ;;  %vm237_vm12 = vcmp.eq.f32.partialorder %v236_v50, 8.507059e+37 }
 0x311   :  { %v883_v45 = vpop.eup %882 }
 0x312   :  { %v228_v46 = vmul.f32 %v883_v45, %v226_v44  ;;  %vm233_vm9 = vweird.f32 %v883_v45  ;;  %v885_v54 = vpop.eup %884 }
 0x313   :  { %vm234_vm11 = vmor %vm232_vm10, %vm233_vm9 }
 0x314   :  { %v229_v47 = vsub.f32 1.0, %v228_v46 }
 0x316   :  { %v230_v49 = vmul.f32 %v883_v45, %v229_v47 }
 0x318   :  { %v231_v51 = vadd.f32 %v883_v45, %v230_v49 }
 0x31a   :  { %v235_v53 = vsel %vm234_vm11, %v883_v45, %v231_v51 }
 0x31b   :  { %v240_v55 = vsel %vm237_vm12, %v239_v52, %v235_v53 }
 0x31c   :  { %v242_v56 = vsel %vm1225_vm5, %v885_v54, %v240_v55 }
 0x31d   :  { %245 = vrot.lane.b32.xlu2 %v242_v56, %s1147_s9  ;;  %v243_v59 = vmul.f32 %v242_v56, %v184_v34 }
 0x377   :  { %v246_v57 = vpop.permute.xlu2 %245 }
 0x378   :  { %v248_v58 = vmul.f32 %v246_v57, %v242_v56  ;;  %v405_v57 = vld [vmem:[#allocation3 + $0x8] sm:$0x3] }
 0x37a   :  { %250 = vrot.lane.b32.xlu0 %v248_v58, %s1143_s23 }
 0x3ec   :  { %v251_v60 = vpop.permute.xlu0 %250 }
 0x3ed   :  { %v253_v61 = vadd.f32 %v251_v60, %v243_v59 }
 0x3ef   :  { %886 = vtanh.f32 %v253_v61 }
 0x3f5   :  { %v887_v62 = vpop.eup %886 }
 0x3f6   :  { %256 = vrot.lane.b32.xlu1 %v887_v62, %s1147_s9 }
 0x468   :  { %v257_v63 = vpop.permute.xlu1 %256 }
 0x469   :  { %v259_v0 = vmul.f32 %v257_v63, %v242_v56 }
 0x46b   :  { %261 = vrot.lane.b32.xlu2 %v259_v0, %s1143_s23 }
 0x4c5   :  { %v262_v1 = vpop.permute.xlu2 %261 }
 0x4c6   :  { %265 = vst.msk [vmem:[#allocation2 + $0x2] sm:$0x3] %vm108_vm0, %v262_v1  ;;  %831 = vmatmul.msk.f32.vlgmr.msra.gmra.mxu2 %vm124_vm1, %v262_v1 }
 0x549   :  { %v287_v3 = vpop.f32.mrf.mxu2 }
 0x54a   :  { %v290_v4 = vadd.f32 %v287_v3, %v267_v2 }
 0x54c   :  { %v832_v5 = vmul.f32 -1.442695, %v290_v4 }
 0x54e   :  { %888 = vpow2.f32 %v832_v5 }
 0x554   :  { %v889_v6 = vpop.eup %888 }
 0x555   :  { %v295_v7 = vadd.f32 1.0, %v889_v6 }
 0x557   :  { %890 = vrcp.f32 %v295_v7  ;;  %v307_v11 = vand.u32 2147483648, %v295_v7  ;;  %v305_v13 = vand.u32 2147483647, %v295_v7  ;;  %vm301_vm14 = vweird.f32 %v295_v7 }
 0x558   :  { %892 = vtanh.f32 %v290_v4 }
 0x559   :  { %v308_v15 = vor.u32 1.1754944e-38, %v307_v11  ;;  %vm306_vm2 = vcmp.eq.f32.partialorder %v305_v13, 8.507059e+37 }
 0x55d   :  { %v891_v8 = vpop.eup %890 }
 0x55e   :  { %v297_v9 = vmul.f32 %v891_v8, %v295_v7  ;;  %vm302_vm13 = vweird.f32 %v891_v8  ;;  %v893_v17 = vpop.eup %892 }
 0x55f   :  { %vm303_vm15 = vmor %vm301_vm14, %vm302_vm13 }
 0x560   :  { %v298_v10 = vsub.f32 1.0, %v297_v9 }
 0x562   :  { %v299_v12 = vmul.f32 %v891_v8, %v298_v10 }
 0x564   :  { %v300_v14 = vadd.f32 %v891_v8, %v299_v12 }
 0x566   :  { %v304_v16 = vsel %vm303_vm15, %v891_v8, %v300_v14 }
 0x567   :  { %v309_v18 = vsel %vm306_vm2, %v308_v15, %v304_v16 }
 0x568   :  { %v311_v19 = vsel %vm1225_vm5, %v893_v17, %v309_v18 }
 0x569   :  { %314 = vrot.lane.b32.xlu0 %v311_v19, %s1147_s9  ;;  %v312_v23 = vmul.f32 %v311_v19, %v253_v61 }
 0x5db   :  { %v315_v20 = vpop.permute.xlu0 %314 }
 0x5dc   :  { %v317_v22 = vmul.f32 %v315_v20, %v311_v19  ;;  %v474_v20 = vld [vmem:[#allocation3 + $0xa] sm:$0x3] }
 0x5de   :  { %319 = vrot.lane.b32.xlu1 %v317_v22, %s1143_s23 }
 0x650   :  { %v320_v24 = vpop.permute.xlu1 %319 }
 0x651   :  { %v322_v25 = vadd.f32 %v320_v24, %v312_v23 }
 0x653   :  { %894 = vtanh.f32 %v322_v25 }
 0x659   :  { %v895_v26 = vpop.eup %894 }
 0x65a   :  { %325 = vrot.lane.b32.xlu2 %v895_v26, %s1147_s9 }
 0x6b4   :  { %v326_v27 = vpop.permute.xlu2 %325 }
 0x6b5   :  { %v328_v28 = vmul.f32 %v326_v27, %v311_v19 }
 0x6b7   :  { %330 = vrot.lane.b32.xlu0 %v328_v28, %s1143_s23 }
 0x729   :  { %v331_v29 = vpop.permute.xlu0 %330 }
 0x72a   :  { %334 = vst.msk [vmem:[#allocation2 + $0x4] sm:$0x3] %vm108_vm0, %v331_v29  ;;  %833 = vmatmul.msk.f32.vlgmr.msra.gmra.mxu3 %vm124_vm1, %v331_v29 }
 0x7ad   :  { %v356_v31 = vpop.f32.mrf.mxu3 }
 0x7ae   :  { %v359_v32 = vadd.f32 %v356_v31, %v336_v30 }
 0x7b0   :  { %v834_v33 = vmul.f32 -1.442695, %v359_v32 }
 0x7b2   :  { %896 = vpow2.f32 %v834_v33 }
 0x7b8   :  { %v897_v34 = vpop.eup %896 }
 0x7b9   :  { %v364_v35 = vadd.f32 1.0, %v897_v34 }
 0x7bb   :  { %898 = vrcp.f32 %v364_v35  ;;  %v376_v39 = vand.u32 2147483648, %v364_v35  ;;  %v374_v41 = vand.u32 2147483647, %v364_v35  ;;  %vm370_vm4 = vweird.f32 %v364_v35 }
 0x7bc   :  { %900 = vtanh.f32 %v359_v32 }
 0x7bd   :  { %v377_v43 = vor.u32 1.1754944e-38, %v376_v39  ;;  %vm375_vm7 = vcmp.eq.f32.partialorder %v374_v41, 8.507059e+37 }
 0x7c1   :  { %v899_v36 = vpop.eup %898 }
 0x7c2   :  { %v366_v37 = vmul.f32 %v899_v36, %v364_v35  ;;  %vm371_vm3 = vweird.f32 %v899_v36  ;;  %v901_v45 = vpop.eup %900 }
 0x7c3   :  { %vm372_vm6 = vmor %vm370_vm4, %vm371_vm3 }
 0x7c4   :  { %v367_v38 = vsub.f32 1.0, %v366_v37 }
 0x7c6   :  { %v368_v40 = vmul.f32 %v899_v36, %v367_v38 }
 0x7c8   :  { %v369_v42 = vadd.f32 %v899_v36, %v368_v40 }
 0x7ca   :  { %v373_v44 = vsel %vm372_vm6, %v899_v36, %v369_v42 }
 0x7cb   :  { %v378_v46 = vsel %vm375_vm7, %v377_v43, %v373_v44 }
 0x7cc   :  { %v380_v47 = vsel %vm1225_vm5, %v901_v45, %v378_v46 }
 0x7cd   :  { %383 = vrot.lane.b32.xlu1 %v380_v47, %s1147_s9  ;;  %v381_v50 = vmul.f32 %v380_v47, %v322_v25 }
 0x83f   :  { %v384_v48 = vpop.permute.xlu1 %383 }
 0x840   :  { %v386_v49 = vmul.f32 %v384_v48, %v380_v47  ;;  %v543_v48 = vld [vmem:[#allocation3 + $0xc] sm:$0x3] }
 0x842   :  { %388 = vrot.lane.b32.xlu2 %v386_v49, %s1143_s23 }
 0x89c   :  { %v389_v51 = vpop.permute.xlu2 %388 }
 0x89d   :  { %v391_v52 = vadd.f32 %v389_v51, %v381_v50 }
 0x89f   :  { %902 = vtanh.f32 %v391_v52 }
 0x8a5   :  { %v903_v53 = vpop.eup %902 }
 0x8a6   :  { %394 = vrot.lane.b32.xlu0 %v903_v53, %s1147_s9 }
 0x918   :  { %v395_v54 = vpop.permute.xlu0 %394 }
 0x919   :  { %v397_v55 = vmul.f32 %v395_v54, %v380_v47 }
 0x91b   :  { %399 = vrot.lane.b32.xlu1 %v397_v55, %s1143_s23 }
 0x98d   :  { %v400_v56 = vpop.permute.xlu1 %399 }
 0x98e   :  { %403 = vst.msk [vmem:[#allocation2 + $0x6] sm:$0x3] %vm108_vm0, %v400_v56  ;;  %835 = vmatmul.msk.f32.vlgmr.msra.gmra.mxu0 %vm124_vm1, %v400_v56 }
 0xa0b   :  { %v425_v58 = vpop.f32.mrf.mxu0 }
 0xa0c   :  { %v428_v59 = vadd.f32 %v425_v58, %v405_v57 }
 0xa0e   :  { %v836_v60 = vmul.f32 -1.442695, %v428_v59 }
 0xa10   :  { %904 = vpow2.f32 %v836_v60 }
 0xa16   :  { %v905_v61 = vpop.eup %904 }
 0xa17   :  { %v433_v62 = vadd.f32 1.0, %v905_v61 }
 0xa19   :  { %906 = vrcp.f32 %v433_v62  ;;  %v445_v2 = vand.u32 2147483648, %v433_v62  ;;  %v443_v4 = vand.u32 2147483647, %v433_v62  ;;  %vm439_vm9 = vweird.f32 %v433_v62 }
 0xa1a   :  { %908 = vtanh.f32 %v428_v59 }
 0xa1b   :  { %v446_v6 = vor.u32 1.1754944e-38, %v445_v2  ;;  %vm444_vm11 = vcmp.eq.f32.partialorder %v443_v4, 8.507059e+37 }
 0xa1f   :  { %v907_v63 = vpop.eup %906 }
 0xa20   :  { %v435_v0 = vmul.f32 %v907_v63, %v433_v62  ;;  %vm440_vm8 = vweird.f32 %v907_v63  ;;  %v909_v8 = vpop.eup %908 }
 0xa21   :  { %vm441_vm10 = vmor %vm439_vm9, %vm440_vm8 }
 0xa22   :  { %v436_v1 = vsub.f32 1.0, %v435_v0 }
 0xa24   :  { %v437_v3 = vmul.f32 %v907_v63, %v436_v1 }
 0xa26   :  { %v438_v5 = vadd.f32 %v907_v63, %v437_v3 }
 0xa28   :  { %v442_v7 = vsel %vm441_vm10, %v907_v63, %v438_v5 }
 0xa29   :  { %v447_v9 = vsel %vm444_vm11, %v446_v6, %v442_v7 }
 0xa2a   :  { %v449_v10 = vsel %vm1225_vm5, %v909_v8, %v447_v9 }
 0xa2b   :  { %452 = vrot.lane.b32.xlu2 %v449_v10, %s1147_s9  ;;  %v450_v13 = vmul.f32 %v449_v10, %v391_v52 }
 0xa85   :  { %v453_v11 = vpop.permute.xlu2 %452 }
 0xa86   :  { %v455_v12 = vmul.f32 %v453_v11, %v449_v10  ;;  %v612_v11 = vld [vmem:[#allocation3 + $0xe] sm:$0x3] }
 0xa88   :  { %457 = vrot.lane.b32.xlu0 %v455_v12, %s1143_s23 }
 0xafa   :  { %v458_v14 = vpop.permute.xlu0 %457 }
 0xafb   :  { %v460_v15 = vadd.f32 %v458_v14, %v450_v13 }
 0xafd   :  { %910 = vtanh.f32 %v460_v15 }
 0xb03   :  { %v911_v16 = vpop.eup %910 }
 0xb04   :  { %463 = vrot.lane.b32.xlu1 %v911_v16, %s1147_s9 }
 0xb76   :  { %v464_v17 = vpop.permute.xlu1 %463 }
 0xb77   :  { %v466_v18 = vmul.f32 %v464_v17, %v449_v10 }
 0xb79   :  { %468 = vrot.lane.b32.xlu2 %v466_v18, %s1143_s23 }
 0xbd3   :  { %v469_v19 = vpop.permute.xlu2 %468 }
 0xbd4   :  { %472 = vst.msk [vmem:[#allocation2 + $0x8] sm:$0x3] %vm108_vm0, %v469_v19  ;;  %837 = vmatmul.msk.f32.vlgmr.msra.gmra.mxu1 %vm124_vm1, %v469_v19 }
 0xc51   :  { %v494_v22 = vpop.f32.mrf.mxu1 }
 0xc52   :  { %v497_v23 = vadd.f32 %v494_v22, %v474_v20 }
 0xc54   :  { %v838_v24 = vmul.f32 -1.442695, %v497_v23 }
 0xc56   :  { %912 = vpow2.f32 %v838_v24 }
 0xc5c   :  { %v913_v25 = vpop.eup %912 }
 0xc5d   :  { %v502_v26 = vadd.f32 1.0, %v913_v25 }
 0xc5f   :  { %914 = vrcp.f32 %v502_v26  ;;  %v514_v30 = vand.u32 2147483648, %v502_v26  ;;  %v512_v32 = vand.u32 2147483647, %v502_v26  ;;  %vm508_vm13 = vweird.f32 %v502_v26 }
 0xc60   :  { %916 = vtanh.f32 %v497_v23 }
 0xc61   :  { %v515_v34 = vor.u32 1.1754944e-38, %v514_v30  ;;  %vm513_vm15 = vcmp.eq.f32.partialorder %v512_v32, 8.507059e+37 }
 0xc65   :  { %v915_v27 = vpop.eup %914 }
 0xc66   :  { %v504_v28 = vmul.f32 %v915_v27, %v502_v26  ;;  %vm509_vm12 = vweird.f32 %v915_v27  ;;  %v917_v36 = vpop.eup %916 }
 0xc67   :  { %vm510_vm14 = vmor %vm508_vm13, %vm509_vm12 }
 0xc68   :  { %v505_v29 = vsub.f32 1.0, %v504_v28 }
 0xc6a   :  { %v506_v31 = vmul.f32 %v915_v27, %v505_v29 }
 0xc6c   :  { %v507_v33 = vadd.f32 %v915_v27, %v506_v31 }
 0xc6e   :  { %v511_v35 = vsel %vm510_vm14, %v915_v27, %v507_v33 }
 0xc6f   :  { %v516_v37 = vsel %vm513_vm15, %v515_v34, %v511_v35 }
 0xc70   :  { %v518_v38 = vsel %vm1225_vm5, %v917_v36, %v516_v37 }
 0xc71   :  { %521 = vrot.lane.b32.xlu0 %v518_v38, %s1147_s9  ;;  %v519_v41 = vmul.f32 %v518_v38, %v460_v15 }
 0xce3   :  { %v522_v39 = vpop.permute.xlu0 %521 }
 0xce4   :  { %v524_v40 = vmul.f32 %v522_v39, %v518_v38  ;;  %v852_v39 = vld [vmem:[#allocation11] sm:$0xff] }
 0xce6   :  { %526 = vrot.lane.b32.xlu1 %v524_v40, %s1143_s23  ;;  %v689_v40 = vld [vmem:[#allocation2 + $0x6] sm:$0x3] }
 0xd58   :  { %v527_v42 = vpop.permute.xlu1 %526 }
 0xd59   :  { %v529_v43 = vadd.f32 %v527_v42, %v519_v41  ;;  %v701_v41 = vrot.slane %v689_v40, 4  ;;  %v1150_v42 = vmov 1983009808  }
 0xd5b   :  { %918 = vtanh.f32 %v529_v43 }
 0xd61   :  { %v919_v44 = vpop.eup %918 }
 0xd62   :  { %532 = vrot.lane.b32.xlu2 %v919_v44, %s1147_s9 }
 0xdbc   :  { %v533_v45 = vpop.permute.xlu2 %532 }
 0xdbd   :  { %v535_v46 = vmul.f32 %v533_v45, %v518_v38  ;;  %v853_v38 = vld [vmem:[#allocation11 + $0x8] sm:$0xff]  ;;  %v687_v45 = vld [vmem:[#allocation2 + $0x2] sm:$0x3] }
 0xdbe   :  { %765 = vmatpush.bf16.msrb.mxu0 %v853_v38 }
 0xdbf   :  { %537 = vrot.lane.b32.xlu0 %v535_v46, %s1143_s23  ;;  %v688_v46 = vld [vmem:[#allocation2 + $0x4] sm:$0x3] }
 0xdc2   :  { %766 = vmatpush.bf16.msrb.mxu0 %v852_v39 }
 0xe31   :  { %v538_v47 = vpop.permute.xlu0 %537 }
 0xe32   :  { %541 = vst.msk [vmem:[#allocation2 + $0xa] sm:$0x3] %vm108_vm0, %v538_v47  ;;  %839 = vmatmul.msk.f32.vlgmr.msrb.gmra.mxu2 %vm124_vm1, %v538_v47 }
 0xeb5   :  { %v563_v49 = vpop.f32.mrf.mxu2 }
 0xeb6   :  { %v566_v50 = vadd.f32 %v563_v49, %v543_v48  ;;  %v694_v49 = vrot.slane %v688_v46, 4 }
 0xeb8   :  { %v840_v51 = vmul.f32 -1.442695, %v566_v50 }
 0xeba   :  { %920 = vpow2.f32 %v840_v51 }
 0xec0   :  { %v921_v52 = vpop.eup %920 }
 0xec1   :  { %v571_v53 = vadd.f32 1.0, %v921_v52  ;;  %v686_v52 = vld [vmem:[#allocation2] sm:$0x3] }
 0xec3   :  { %922 = vrcp.f32 %v571_v53  ;;  %v583_v57 = vand.u32 2147483648, %v571_v53  ;;  %v581_v59 = vand.u32 2147483647, %v571_v53  ;;  %vm577_vm3 = vweird.f32 %v571_v53 }
 0xec4   :  { %924 = vtanh.f32 %v566_v50 }
 0xec5   :  { %v584_v61 = vor.u32 1.1754944e-38, %v583_v57  ;;  %vm582_vm6 = vcmp.eq.f32.partialorder %v581_v59, 8.507059e+37 }
 0xec9   :  { %v923_v54 = vpop.eup %922 }
 0xeca   :  { %v573_v55 = vmul.f32 %v923_v54, %v571_v53  ;;  %vm578_vm2 = vweird.f32 %v923_v54  ;;  %v925_v63 = vpop.eup %924 }
 0xecb   :  { %vm579_vm4 = vmor %vm577_vm3, %vm578_vm2 }
 0xecc   :  { %v574_v56 = vsub.f32 1.0, %v573_v55  ;;  %v1151_v55 = vmov 1934713408  }
 0xece   :  { %v575_v58 = vmul.f32 %v923_v54, %v574_v56  ;;  %v722_v56 = vunpack.c.l.s4 %v1151_v55 }
 0xed0   :  { %v576_v60 = vadd.f32 %v923_v54, %v575_v58 }
 0xed2   :  { %v580_v62 = vsel %vm579_vm4, %v923_v54, %v576_v60  ;;  %v690_v60 = vld [vmem:[#allocation2 + $0x8] sm:$0x3] }
 0xed3   :  { %v585_v0 = vsel %vm582_vm6, %v584_v61, %v580_v62  ;;  %v691_v61 = vld [vmem:[#allocation2 + $0xa] sm:$0x3] }
 0xed4   :  { %v587_v1 = vsel %vm1225_vm5, %v925_v63, %v585_v0 }
 0xed5   :  { %590 = vrot.lane.b32.xlu1 %v587_v1, %s1147_s9  ;;  %v588_v4 = vmul.f32 %v587_v1, %v529_v43  ;;  %v698_v43 = vunpack.c.l.s4 %v1150_v42 }
 0xed7   :  { %v699_v48 = vunpack.c.0.s8 %v698_v43 }
 0xf47   :  { %v591_v2 = vpop.permute.xlu1 %590 }
 0xf48   :  { %v593_v3 = vmul.f32 %v591_v2, %v587_v1 }
 0xf4a   :  { %595 = vrot.lane.b32.xlu2 %v593_v3, %s1143_s23 }
 0xfa4   :  { %v596_v5 = vpop.permute.xlu2 %595 }
 0xfa5   :  { %v598_v6 = vadd.f32 %v596_v5, %v588_v4 }
 0xfa7   :  { %926 = vtanh.f32 %v598_v6 }
 0xfad   :  { %v927_v7 = vpop.eup %926 }
 0xfae   :  { %601 = vrot.lane.b32.xlu0 %v927_v7, %s1147_s9 }
0x1020   :  { %v602_v8 = vpop.permute.xlu0 %601 }
0x1021   :  { %v604_v9 = vmul.f32 %v602_v8, %v587_v1  ;;  %v723_v1 = vunpack.c.0.s8 %v722_v56 }
0x1023   :  { %606 = vrot.lane.b32.xlu1 %v604_v9, %s1143_s23 }
0x1095   :  { %v607_v10 = vpop.permute.xlu1 %606 }
0x1096   :  { %610 = vst.msk [vmem:[#allocation2 + $0xc] sm:$0x3] %vm108_vm0, %v607_v10  ;;  %841 = vmatmul.msk.f32.vlgmr.msrb.gmra.mxu3 %vm124_vm1, %v607_v10 }
0x109d   :  { %v692_v50 = vld [vmem:[#allocation2 + $0xc] sm:$0x3] }
0x109e   :  { %v707_v54 = vrot.slane %v692_v50, 4 }
0x1119   :  { %v632_v12 = vpop.f32.mrf.mxu3 }
0x111a   :  { %v635_v13 = vadd.f32 %v632_v12, %v612_v11 }
0x111c   :  { %v842_v14 = vmul.f32 -1.442695, %v635_v13 }
0x111e   :  { %928 = vpow2.f32 %v842_v14  ;;  %v871_v14 = vld [vmem:[%s1324_s5] ss:$0 sm:$0xff] }
0x1124   :  { %v929_v15 = vpop.eup %928 }
0x1125   :  { %v640_v16 = vadd.f32 1.0, %v929_v15 }
0x1127   :  { %930 = vrcp.f32 %v640_v16  ;;  %v652_v20 = vand.u32 2147483648, %v640_v16  ;;  %v650_v23 = vand.u32 2147483647, %v640_v16  ;;  %vm646_vm8 = vweird.f32 %v640_v16 }
0x1128   :  { %932 = vtanh.f32 %v635_v13 }
0x1129   :  { %v653_v25 = vor.u32 1.1754944e-38, %v652_v20  ;;  %vm651_vm10 = vcmp.eq.f32.partialorder %v650_v23, 8.507059e+37 }
0x112d   :  { %v931_v17 = vpop.eup %930 }
0x112e   :  { %v642_v18 = vmul.f32 %v931_v17, %v640_v16  ;;  %vm647_vm7 = vweird.f32 %v931_v17  ;;  %v933_v27 = vpop.eup %932 }
0x112f   :  { %vm648_vm9 = vmor %vm646_vm8, %vm647_vm7 }
0x1130   :  { %v643_v19 = vsub.f32 1.0, %v642_v18 }
0x1132   :  { %v644_v22 = vmul.f32 %v931_v17, %v643_v19 }
0x1134   :  { %v645_v24 = vadd.f32 %v931_v17, %v644_v22 }
0x1136   :  { %v649_v26 = vsel %vm648_vm9, %v931_v17, %v645_v24 }
0x1137   :  { %v654_v28 = vsel %vm651_vm10, %v653_v25, %v649_v26 }
0x1138   :  { %v656_v29 = vsel %vm1225_vm5, %v933_v27, %v654_v28  ;;  %vm695_vm5 = vcmask 1047556  }
0x1139   :  { %659 = vrot.lane.b32.xlu2 %v656_v29, %s1147_s9  ;;  %v657_v32 = vmul.f32 %v656_v29, %v598_v6  ;;  %v702_v47 = vsel %vm695_vm5, %v701_v41, %v687_v45  ;;  %v696_v53 = vsel %vm695_vm5, %v694_v49, %v686_v52  ;;  %v708_v63 = vsel %vm695_vm5, %v707_v54, %v690_v60 }
0x113a   :  { %v706_v51 = vperm.slane %v702_v47, %v699_v48  ;;  %v700_v62 = vperm.slane %v696_v53, %v699_v48  ;;  %v712_v4 = vperm.slane %v708_v63, %v699_v48 }
0x113c   :  { %v719_v58 = vrot.slane %v706_v51, 4 }
0x113e   :  { %v720_v3 = vsel %vm695_vm5, %v719_v58, %v700_v62 }
0x113f   :  { %v724_v6 = vperm.slane %v720_v3, %v723_v1 }
0x1141   :  { %v733_v10 = vrot.slane %v724_v6, 4 }
0x1193   :  { %v660_v30 = vpop.permute.xlu2 %659 }
0x1194   :  { %v662_v31 = vmul.f32 %v660_v30, %v656_v29 }
0x1196   :  { %664 = vrot.lane.b32.xlu0 %v662_v31, %s1143_s23 }
0x1208   :  { %v665_v33 = vpop.permute.xlu0 %664 }
0x1209   :  { %v667_v34 = vadd.f32 %v665_v33, %v657_v32 }
0x120b   :  { %934 = vtanh.f32 %v667_v34  ;;  %682 = vrot.lane.b32.xlu0 %v667_v34, %s1149_s4 }
0x1211   :  { %v935_v35 = vpop.eup %934 }
0x1212   :  { %670 = vrot.lane.b32.xlu1 %v935_v35, %s1147_s9 }
0x127d   :  { %v683_v36 = vpop.permute.xlu0 %682 }
0x127e   :  { %685 = vst.msk [vmem:[#allocation15] sm:$0x3] %vm108_vm0, %v683_v36 }
0x1284   :  { %v671_v21 = vpop.permute.xlu1 %670 }
0x1285   :  { %v673_v37 = vmul.f32 %v671_v21, %v656_v29 }
0x1287   :  { %675 = vrot.lane.b32.xlu2 %v673_v37, %s1143_s23 }
0x12e1   :  { %v676_v44 = vpop.permute.xlu2 %675 }
0x12e2   :  { %679 = vst.msk [vmem:[#allocation2 + $0xe] sm:$0x3] %vm108_vm0, %v676_v44 }
0x12e3   :  { %680 = vst.msk [vmem:[#allocation13] sm:$0x3] %vm108_vm0, %v676_v44 }
0x12e4   :  { %798 = dma.vmem_to_hbm [thread:$0]  %s794_s11, 32, %s796_s14, [#allocation14]  }
0x12e5   :  { %809 = dma.vmem_to_hbm [thread:$0]  %s805_s17, 32, %s807_s20, [#allocation14]  }
0x12e9   :  { %v693_v57 = vld [vmem:[#allocation2 + $0xe] sm:$0x3] }
0x12ea   :  { %v713_v59 = vrot.slane %v693_v57, 4 }
0x12ec   :  { %v714_v0 = vsel %vm695_vm5, %v713_v59, %v691_v61 }
0x12ed   :  { %v718_v2 = vperm.slane %v714_v0, %v699_v48 }
0x12ef   :  { %v725_v5 = vrot.slane %v718_v2, 4 }
0x12f1   :  { %v726_v7 = vsel %vm695_vm5, %v725_v5, %v712_v4 }
0x12f2   :  { %v730_v8 = vperm.slane %v726_v7, %v723_v1 }
0x12f4   :  { %v731_v9 = vrot.slane %v730_v8, 4  ;;  %v734_v12 = vsel %vm695_vm5, %v730_v8, %v733_v10 }
0x12f6   :  { %v732_v11 = vsel %vm695_vm5, %v731_v9, %v724_v6 }
0x12f7   :  { %v739_v13 = vpack.c.bf16 %v734_v12, %v732_v11 }
0x12f9   :  { %851 = vmatmul.msk.bf16.vlgmr.msrb.gmra.mxu0 %vm124_vm1, %v739_v13 }
0x1376   :  { %v768_v15 = vpop.f32.mrf.mxu0 }
0x1377   :  { %v769_v16 = vadd.f32 %v871_v14, %v768_v15 }
0x1379   :  { %773 = vst [vmem:[#allocation12] sm:$0xff] %v769_v16 }
0x137e   :  { %v770_v17 = vpop.f32.mrf.mxu0 }
0x137f   :  { %v771_v18 = vadd.f32 %v871_v14, %v770_v17 }
0x1381   :  { %774 = vst [vmem:[#allocation12 + $0x8] sm:$0xff] %v771_v18 }
0x1382   :  { %787 = dma.vmem_to_hbm [thread:$0]  %s780_s22, 256, %s782_s25, [#allocation5], %s1140_s15, %s1140_s15, %s1141_s16  }
0x1383   :  { %1134 = dma.done.wait [#allocation5], 256  }
0x1384   :  { %1135 = vsyncadd [#allocation5], 4294967040 }
0x1385   :  { %1136 = dma.done.wait [#allocation14], 64  }
0x1386   :  { %1137 = vsyncadd [#allocation14], 4294967232 }
0x1387   :  { %822 = vsyncpa [#allocation4], 1 }
0x1388   :  { %823 = vsyncpa [#allocation7], 1 }
0x1389   :  { %824 = vsyncpa [#allocation10], 1 }
0x138a   :  { %825 = vsyncpa [#allocation5], 1 }
0x138b   :  { %826 = vsyncpa [#allocation14], 1 }

</bundles_post_ra>
